<compile_context>
chip_gen: v5e
topology: v5e:2x2
jax: 0.10.0
libtpu: 0.0.40
codegen_flags: <defaults>
</compile_context>

<pallas_src>
import jax
import jax.numpy as jnp
from jax.experimental import pallas as pl
from jax.experimental.pallas import tpu as pltpu


def _make_kernel(chunk, hidden, n_chunks):
    """Builds the fused multi-head kernel for a fixed head-chunk size."""

    def kernel(x_ref, we_ref, be_ref, w1_ref, b1_ref, w2_ref, b2_ref,
               out_ref, emb_ref):
        j = pl.program_id(1)                      # head-chunk index (innermost)

        # ---- once per batch tile: shared embedding (+ output-bias init) ----
        @pl.when(j == 0)
        def _():
            emb = jnp.dot(x_ref[...].astype(jnp.bfloat16), we_ref[...],
                          preferred_element_type=jnp.float32)
            emb = jnp.maximum(emb + be_ref[...], 0.0)        # f32 bias + ReLU
            emb_ref[...] = emb.astype(emb_ref.dtype)         # bf16 MXU operand
            if n_chunks > 1:
                # biases live in the resident output tile; chunks accumulate
                out_ref[...] = jnp.broadcast_to(b2_ref[...], out_ref.shape)

        # ---- C fused heads: ONE (tb, E) @ (E, C*H) MXU matmul --------------
        h = jnp.dot(emb_ref[...], w1_ref[...],
                    preferred_element_type=jnp.float32)      # (tb, C*H) f32
        h = jnp.maximum(h + b1_ref[...], 0.0)

        # ---- per-head Linear(H, 1): VPU multiply + per-H-group lane reduce -
        p = h * w2_ref[...]                                  # (tb, C*H) f32
        cols = jnp.concatenate(
            [jnp.sum(p[:, c * hidden:(c + 1) * hidden], axis=-1, keepdims=True)
             for c in range(chunk)], axis=-1)                # (tb, C) f32

        if n_chunks == 1:
            out_ref[...] = cols + b2_ref[...]                # one dense store
        else:
            off = pl.multiple_of(j * chunk, chunk)
            out_ref[:, pl.ds(off, chunk)] += cols            # bias already set

    return kernel


def _num_tensorcores():
    """Best-effort TensorCore count (megacore split only helps when > 1)."""
    try:
        dev = jax.devices()[0]
    except Exception:
        return 1
    for attr in ("num_cores", "core_count"):
        v = getattr(dev, attr, None)
        if isinstance(v, int) and v > 0:
            return v
    return 1


def _pick_batch_tile(batch, requested, n_cores):
    if requested is not None:
        tb = requested
    else:
        tb = batch
        if batch > 512:                       # largest /8 divisor <= 512
            for cand in range(512, 7, -8):
                if batch % cand == 0:
                    tb = cand
                    break
        # Only split the batch axis when the chip actually has >1 TensorCore
        # (v7x); on v5e/v6e halving just doubles per-step overhead.
        if n_cores > 1 and batch // tb < 2:
            half = tb // 2
            if half >= 8 and tb % 2 == 0 and half % 8 == 0:
                tb = half
    assert batch % tb == 0, (batch, tb)
    assert tb == batch or tb % 8 == 0, "batch tile must be a sublane multiple"
    return tb


def _pick_head_chunk(out_dim, embed_dim, hidden_dim, requested):
    if requested is not None:
        chunk = requested
    else:
        budget = 8 << 20                      # bf16 W1-chunk budget (v7x-safe)
        per_head = embed_dim * hidden_dim * 2
        chunk = max(1, min(out_dim, budget // max(per_head, 1)))
    chunk = min(chunk, out_dim)
    while out_dim % chunk:
        chunk -= 1
    if chunk < out_dim and (chunk * hidden_dim) % 128:
        # packed-W1 chunk's lane width must be a multiple of 128
        ok = [c for c in range(chunk, 0, -1)
              if out_dim % c == 0 and (c * hidden_dim) % 128 == 0]
        chunk = ok[0] if ok else out_dim
    return chunk


def _vmem_limit_bytes(tb, feat, embed, out_dim, hidden, chunk):
    """Footprint-derived VMEM limit (double-buffered blocks + temporaries)."""
    dbl = 2
    buf = 0
    buf += tb * feat * 4 * dbl                # x (f32)
    buf += feat * embed * 2 * dbl             # We (bf16)
    buf += embed * 4 * dbl                    # be (f32)
    buf += embed * chunk * hidden * 2 * dbl   # W1 chunk (bf16)
    buf += chunk * hidden * 4 * dbl * 2       # b1, w2 chunks (f32)
    buf += out_dim * 4 * dbl                  # b2 (f32)
    buf += tb * out_dim * 4 * dbl             # out (f32)
    buf += tb * embed * 2                     # emb scratch (bf16)
    # in-kernel temporaries: f32 emb, bf16 x copy, f32 hidden + product
    buf += tb * embed * 4 + tb * feat * 2 + 2 * tb * chunk * hidden * 4
    return int(max(16 << 20, min(2 * buf + (1 << 20), 48 << 20)))


def multi_head_molecule_prediction(x, params, *, batch_tile=None,
                                   head_chunk=None):
    """x: (B, F) molecule features. Returns (B, output_dim) predictions."""
    we, be, w1h, b1h, w2h, b2 = params
    B, F = x.shape
    E = we.shape[1]
    O, _, H = w1h.shape

    tb = _pick_batch_tile(B, batch_tile, _num_tensorcores())
    C = _pick_head_chunk(O, E, H, head_chunk)
    n_chunks = O // C

    # Pack per-head weights head-major along lanes so the fused matmul's N
    # dimension (= C*H) is lane-contiguous; bf16 only for MXU operands.
    we_bf = we.astype(jnp.bfloat16)
    w1_packed = jnp.transpose(w1h, (1, 0, 2)).reshape(E, O * H)
    w1_packed = w1_packed.astype(jnp.bfloat16)
    b1_packed = b1h.reshape(1, O * H)                 # f32
    w2_packed = w2h.reshape(1, O * H)                 # f32

    kernel = _make_kernel(C, H, n_chunks)
    const2d = lambda i, j: (0, 0)

    return pl.pallas_call(
        kernel,
        out_shape=jax.ShapeDtypeStruct((B, O), jnp.float32),
        grid_spec=pltpu.PrefetchScalarGridSpec(
            num_scalar_prefetch=0,
            grid=(B // tb, n_chunks),                 # head axis innermost
            in_specs=[
                pl.BlockSpec((tb, F), lambda i, j: (i, 0)),      # x (f32)
                pl.BlockSpec((F, E), const2d),                   # We (bf16)
                pl.BlockSpec((1, E), const2d),                   # be (f32)
                pl.BlockSpec((E, C * H), lambda i, j: (0, j)),   # W1 chunk
                pl.BlockSpec((1, C * H), lambda i, j: (0, j)),   # b1 chunk
                pl.BlockSpec((1, C * H), lambda i, j: (0, j)),   # w2 chunk
                pl.BlockSpec((1, O), const2d),                   # b2 (f32)
            ],
            out_specs=pl.BlockSpec((tb, O), lambda i, j: (i, 0)),
            scratch_shapes=[pltpu.VMEM((tb, E), jnp.bfloat16)],
        ),
        compiler_params=pltpu.CompilerParams(
            dimension_semantics=("parallel", "arbitrary"),
            vmem_limit_bytes=_vmem_limit_bytes(tb, F, E, O, H, C)),
    )(x, we_bf, be, w1_packed, b1_packed, w2_packed, b2)


def init_params(key, feat_dim, embed_dim, hidden_dim, output_dim):
    """Deterministic synthetic parameters (PyTorch Linear-equivalent)."""
    ks = jax.random.split(key, 6)
    s = 0.05
    we = jax.random.normal(ks[0], (feat_dim, embed_dim), jnp.float32) * s
    be = jax.random.normal(ks[1], (1, embed_dim), jnp.float32) * s
    w1h = jax.random.normal(
        ks[2], (output_dim, embed_dim, hidden_dim), jnp.float32) * s
    b1h = jax.random.normal(ks[3], (output_dim, 1, hidden_dim), jnp.float32) * s
    w2h = jax.random.normal(ks[4], (output_dim, 1, hidden_dim), jnp.float32) * s
    b2 = jax.random.normal(ks[5], (1, output_dim), jnp.float32) * s
    return we, be, w1h, b1h, w2h, b2


def reference_forward(x, params):
    """Pure-JAX f32 reference mirroring the PyTorch module's forward."""
    we, be, w1h, b1h, w2h, b2 = params
    emb = jnp.maximum(x @ we + be, 0.0)                       # embedding_model
    cols = []
    for o in range(w1h.shape[0]):                             # per-task head
        h = jnp.maximum(emb @ w1h[o] + b1h[o], 0.0)           # Linear -> ReLU
        cols.append(h @ w2h[o, 0][:, None] + b2[0, o])        # Linear(H, 1)
    return jnp.concatenate(cols, axis=1)                      # cat(dim=1)


if __name__ == "__main__":
    # Small deterministic example: batch=32, feat=32, embed=128,
    # hidden=128 (module default), tasks=4.
    B, F, E, HID, O = 32, 32, 128, 128, 4
    key = jax.random.PRNGKey(0)
    kx, kp = jax.random.split(key)
    x = jax.random.normal(kx, (B, F), jnp.float32)
    params = init_params(kp, F, E, HID, O)

    fwd = jax.jit(multi_head_molecule_prediction)
    out = jax.block_until_ready(fwd(x, params))

    ref = reference_forward(x, params)
    assert out.shape == (B, O), out.shape
    # bf16 matmul operands (f32 accumulation) -> loosened tolerance vs f32 ref.
    max_err = float(jnp.max(jnp.abs(out - ref)))
    assert jnp.allclose(out, ref, atol=2e-2, rtol=2e-2), max_err
    print("KERNEL_OK")
</pallas_src>

<mosaic_0001>
module attributes {stable_mosaic.version = 11 : i64} {
  func.func @kernel(%arg0: i32, %arg1: i32, %arg2: memref<32x32xf32, #tpu.memory_space<vmem>>, %arg3: memref<32x128xbf16, #tpu.memory_space<vmem>>, %arg4: memref<1x128xf32, #tpu.memory_space<vmem>>, %arg5: memref<128x512xbf16, #tpu.memory_space<vmem>>, %arg6: memref<1x512xf32, #tpu.memory_space<vmem>>, %arg7: memref<1x512xf32, #tpu.memory_space<vmem>>, %arg8: memref<1x4xf32, #tpu.memory_space<vmem>>, %arg9: memref<32x4xf32, #tpu.memory_space<vmem>>, %arg10: memref<32x128xbf16, #tpu.memory_space<vmem>>) attributes {dimension_semantics = [#tpu.dimension_semantics<parallel>, #tpu.dimension_semantics<arbitrary>], iteration_bounds = array<i64: 1, 1>, scalar_prefetch = 0 : i64, scratch_operands = 1 : i64, tpu.core_type = #tpu.core_type<tc>, window_params = [{transform_indices = @transform_0, window_bounds = array<i64: 32, 32>}, {pipeline_mode = #tpu.pipeline_mode<synchronous>, transform_indices = @transform_1, window_bounds = array<i64: 32, 128>}, {pipeline_mode = #tpu.pipeline_mode<synchronous>, transform_indices = @transform_2, window_bounds = array<i64: 1, 128>}, {transform_indices = @transform_3, window_bounds = array<i64: 128, 512>}, {transform_indices = @transform_4, window_bounds = array<i64: 1, 512>}, {transform_indices = @transform_5, window_bounds = array<i64: 1, 512>}, {pipeline_mode = #tpu.pipeline_mode<synchronous>, transform_indices = @transform_6, window_bounds = array<i64: 1, 4>}, {transform_indices = @transform_7, window_bounds = array<i64: 32, 4>}]} {
    %c0_i32 = arith.constant 0 : i32
    %0 = arith.cmpi eq, %arg1, %c0_i32 : i32
    %1 = arith.extui %0 : i1 to i32
    %c0_i32_0 = arith.constant 0 : i32
    %2 = arith.cmpi ne, %1, %c0_i32_0 : i32
    scf.if %2 {
      %c0_17 = arith.constant 0 : index
      %c0_18 = arith.constant 0 : index
      %31 = vector.load %arg2[%c0_17, %c0_18] : memref<32x32xf32, #tpu.memory_space<vmem>>, vector<32x32xf32>
      %32 = arith.truncf %31 : vector<32x32xf32> to vector<32x32xbf16>
      %c0_19 = arith.constant 0 : index
      %c0_20 = arith.constant 0 : index
      %33 = vector.load %arg3[%c0_19, %c0_20] : memref<32x128xbf16, #tpu.memory_space<vmem>>, vector<32x128xbf16>
      %cst_21 = arith.constant dense<0.000000e+00> : vector<32x128xf32>
      %34 = tpu.matmul %32, %33, %cst_21 {dimension_numbers = #tpu.dot_dimension_numbers<[1], [0], [0], [1], [0, 0, 1, 1], [], []>} : vector<32x32xbf16>, vector<32x128xbf16>, vector<32x128xf32> -> vector<32x128xf32>
      %c0_22 = arith.constant 0 : index
      %c0_23 = arith.constant 0 : index
      %35 = vector.load %arg4[%c0_22, %c0_23] : memref<1x128xf32, #tpu.memory_space<vmem>>, vector<1x128xf32>
      %36 = vector.broadcast %35 : vector<1x128xf32> to vector<32x128xf32>
      %37 = arith.addf %34, %36 : vector<32x128xf32>
      %cst_24 = arith.constant 0.000000e+00 : f32
      %38 = vector.broadcast %cst_24 : f32 to vector<32x128xf32>
      %39 = arith.maximumf %37, %38 : vector<32x128xf32>
      %40 = arith.truncf %39 : vector<32x128xf32> to vector<32x128xbf16>
      %c0_25 = arith.constant 0 : index
      %c0_26 = arith.constant 0 : index
      %41 = vector.load %arg10[%c0_25, %c0_26] : memref<32x128xbf16, #tpu.memory_space<vmem>>, vector<32x128xbf16>
      tpu.vector_store %arg10[%c0_25, %c0_26], %40 {strides = array<i32>} : memref<32x128xbf16, #tpu.memory_space<vmem>>, vector<32x128xbf16>,
    } else {
    }
    %c0 = arith.constant 0 : index
    %c0_1 = arith.constant 0 : index
    %3 = vector.load %arg10[%c0, %c0_1] : memref<32x128xbf16, #tpu.memory_space<vmem>>, vector<32x128xbf16>
    %c0_2 = arith.constant 0 : index
    %c0_3 = arith.constant 0 : index
    %4 = vector.load %arg5[%c0_2, %c0_3] : memref<128x512xbf16, #tpu.memory_space<vmem>>, vector<128x512xbf16>
    %cst = arith.constant dense<0.000000e+00> : vector<32x512xf32>
    %5 = tpu.matmul %3, %4, %cst {dimension_numbers = #tpu.dot_dimension_numbers<[1], [0], [0], [1], [0, 0, 1, 1], [], []>} : vector<32x128xbf16>, vector<128x512xbf16>, vector<32x512xf32> -> vector<32x512xf32>
    %c0_4 = arith.constant 0 : index
    %c0_5 = arith.constant 0 : index
    %6 = vector.load %arg6[%c0_4, %c0_5] : memref<1x512xf32, #tpu.memory_space<vmem>>, vector<1x512xf32>
    %7 = vector.broadcast %6 : vector<1x512xf32> to vector<32x512xf32>
    %8 = arith.addf %5, %7 : vector<32x512xf32>
    %cst_6 = arith.constant 0.000000e+00 : f32
    %9 = vector.broadcast %cst_6 : f32 to vector<32x512xf32>
    %10 = arith.maximumf %8, %9 : vector<32x512xf32>
    %c0_7 = arith.constant 0 : index
    %c0_8 = arith.constant 0 : index
    %11 = vector.load %arg7[%c0_7, %c0_8] : memref<1x512xf32, #tpu.memory_space<vmem>>, vector<1x512xf32>
    %12 = vector.broadcast %11 : vector<1x512xf32> to vector<32x512xf32>
    %13 = arith.mulf %10, %12 : vector<32x512xf32>
    %14 = vector.extract_strided_slice %13 {offsets = [0, 0], sizes = [32, 128], strides = [1, 1]} : vector<32x512xf32> to vector<32x128xf32>
    %cst_9 = arith.constant dense<0.000000e+00> : vector<32xf32>
    %15 = vector.multi_reduction <add>, %14, %cst_9 [1] : vector<32x128xf32> to vector<32xf32>
    %16 = vector.shape_cast %15 : vector<32xf32> to vector<32x1xf32>
    %17 = vector.extract_strided_slice %13 {offsets = [0, 128], sizes = [32, 128], strides = [1, 1]} : vector<32x512xf32> to vector<32x128xf32>
    %cst_10 = arith.constant dense<0.000000e+00> : vector<32xf32>
    %18 = vector.multi_reduction <add>, %17, %cst_10 [1] : vector<32x128xf32> to vector<32xf32>
    %19 = vector.shape_cast %18 : vector<32xf32> to vector<32x1xf32>
    %20 = vector.extract_strided_slice %13 {offsets = [0, 256], sizes = [32, 128], strides = [1, 1]} : vector<32x512xf32> to vector<32x128xf32>
    %cst_11 = arith.constant dense<0.000000e+00> : vector<32xf32>
    %21 = vector.multi_reduction <add>, %20, %cst_11 [1] : vector<32x128xf32> to vector<32xf32>
    %22 = vector.shape_cast %21 : vector<32xf32> to vector<32x1xf32>
    %23 = vector.extract_strided_slice %13 {offsets = [0, 384], sizes = [32, 128], strides = [1, 1]} : vector<32x512xf32> to vector<32x128xf32>
    %cst_12 = arith.constant dense<0.000000e+00> : vector<32xf32>
    %24 = vector.multi_reduction <add>, %23, %cst_12 [1] : vector<32x128xf32> to vector<32xf32>
    %25 = vector.shape_cast %24 : vector<32xf32> to vector<32x1xf32>
    %26 = tpu.concatenate %16, %19, %22, %25 in 1 : vector<32x1xf32>, vector<32x1xf32>, vector<32x1xf32>, vector<32x1xf32> -> vector<32x4xf32>
    %c0_13 = arith.constant 0 : index
    %c0_14 = arith.constant 0 : index
    %27 = vector.load %arg8[%c0_13, %c0_14] : memref<1x4xf32, #tpu.memory_space<vmem>>, vector<1x4xf32>
    %28 = vector.broadcast %27 : vector<1x4xf32> to vector<32x4xf32>
    %29 = arith.addf %26, %28 : vector<32x4xf32>
    %c0_15 = arith.constant 0 : index
    %c0_16 = arith.constant 0 : index
    %30 = vector.load %arg9[%c0_15, %c0_16] : memref<32x4xf32, #tpu.memory_space<vmem>>, vector<32x4xf32>
    tpu.vector_store %arg9[%c0_15, %c0_16], %29 {strides = array<i32>} : memref<32x4xf32, #tpu.memory_space<vmem>>, vector<32x4xf32>,
    return
  }
  func.func @transform_0(%arg0: i32, %arg1: i32) -> (i32, i32) {
    %c0_i32 = arith.constant 0 : i32
    %c0_i32_0 = arith.constant 0 : i32
    return %arg0, %c0_i32 : i32, i32
  }
  func.func @transform_1(%arg0: i32, %arg1: i32) -> (i32, i32) {
    %c0_i32 = arith.constant 0 : i32
    %c0_i32_0 = arith.constant 0 : i32
    %c0_i32_1 = arith.constant 0 : i32
    return %c0_i32, %c0_i32_0 : i32, i32
  }
  func.func @transform_2(%arg0: i32, %arg1: i32) -> (i32, i32) {
    %c0_i32 = arith.constant 0 : i32
    %c0_i32_0 = arith.constant 0 : i32
    %c0_i32_1 = arith.constant 0 : i32
    return %c0_i32, %c0_i32_0 : i32, i32
  }
  func.func @transform_3(%arg0: i32, %arg1: i32) -> (i32, i32) {
    %c0_i32 = arith.constant 0 : i32
    %c0_i32_0 = arith.constant 0 : i32
    return %c0_i32, %arg1 : i32, i32
  }
  func.func @transform_4(%arg0: i32, %arg1: i32) -> (i32, i32) {
    %c0_i32 = arith.constant 0 : i32
    %c0_i32_0 = arith.constant 0 : i32
    return %c0_i32, %arg1 : i32, i32
  }
  func.func @transform_5(%arg0: i32, %arg1: i32) -> (i32, i32) {
    %c0_i32 = arith.constant 0 : i32
    %c0_i32_0 = arith.constant 0 : i32
    return %c0_i32, %arg1 : i32, i32
  }
  func.func @transform_6(%arg0: i32, %arg1: i32) -> (i32, i32) {
    %c0_i32 = arith.constant 0 : i32
    %c0_i32_0 = arith.constant 0 : i32
    %c0_i32_1 = arith.constant 0 : i32
    return %c0_i32, %c0_i32_0 : i32, i32
  }
  func.func @transform_7(%arg0: i32, %arg1: i32) -> (i32, i32) {
    %c0_i32 = arith.constant 0 : i32
    %c0_i32_0 = arith.constant 0 : i32
    return %arg0, %c0_i32 : i32, i32
  }
}

</mosaic_0001>

<bundles_post_ra>
// kernel: multi_head_molecule_prediction.1
= control target key start
LH: loop header
LB: loop body
LE: loop exit
PB: predicated region body
PF: predicated region fallthrough
CT: control target
= control target key end

     0   :  { %vm57_vm0 = vcmask 261120   ;;  %vm463_vm1 = vcmask 7168   ;;  %vm468_vm2 = vcmask 15360   ;;  %vm473_vm3 = vcmask 23552   ;;  %s1006_s1 = inlined_call_operand.vmem [shape: bf16[32,128], index: 1, kind: input, shape index: {}]   ;;  %s1007_s0 = inlined_call_operand.vmem [shape: f32[32,32], index: 0, kind: input, shape index: {}]   ;;  %s1008_s3 = inlined_call_operand.vmem [shape: bf16[128,512], index: 3, kind: input, shape index: {}]   ;;  %s1009_s2 = inlined_call_operand.vmem [shape: f32[1,128], index: 2, kind: input, shape index: {}]   ;;  %s1010_s4 = inlined_call_operand.vmem [shape: f32[1,512], index: 4, kind: input, shape index: {}]   ;;  %s1011_s5 = inlined_call_operand.vmem [shape: f32[1,512], index: 5, kind: input, shape index: {}]   ;;  %s1012_s6 = inlined_call_operand.vmem [shape: f32[1,4], index: 6, kind: input, shape index: {}]   ;;  %s1013_s7 = inlined_call_operand.vmem [shape: f32[32,4], index: 7, kind: output, shape index: {}]  }
   0x1   :  { %v642_v0 = vld [vmem:[%s1006_s1 + $0x8] sm:$0xff]  ;;  %v641_v1 = vld [vmem:[%s1006_s1] sm:$0xff]  ;;  %v675_v5 = vld [vmem:[%s1008_s3 + $0xec] sm:$0xf0]  ;;  %vm486_vm4 = vcmask 31744  }
   0x2   :  { %v31_v2 = vld [vmem:[%s1007_s0] sm:$0xff]  ;;  %v32_v3 = vld [vmem:[%s1007_s0 + $0x8] sm:$0xff]  ;;  %70 = vmatpush.bf16.msra.mxu0 %v642_v0  ;;  %v629_v8 = vld [vmem:[%s1008_s3 + $0xf0] sm:$0xf0] }
   0x3   :  { %v627_v4 = vld [vmem:[%s1008_s3 + $0xe0] sm:$0xf]  ;;  %v673_v6 = vld [vmem:[%s1008_s3 + $0xe4] sm:$0xf]  ;;  %v635_v9 = vld [vmem:[%s1008_s3 + $0xe8] sm:$0xf]  ;;  %v35_v16 = vpack.c.bf16 %v32_v3, %v31_v2 }
   0x4   :  { %v628_v7 = vor.u32 %v675_v5, %v627_v4  ;;  %v676_v10 = vld [vmem:[%s1008_s3 + $0xf4] sm:$0xf0]  ;;  %v632_v11 = vor.u32 %v673_v6, %v629_v8  ;;  %v674_v13 = vld [vmem:[%s1008_s3 + $0xec] sm:$0xf]  ;;  %v637_v14 = vld [vmem:[%s1008_s3 + $0xf8] sm:$0xf0] }
   0x5   :  { %v636_v12 = vor.u32 %v676_v10, %v635_v9  ;;  %v611_v15 = vld [vmem:[%s1008_s3 + $0xc0] sm:$0xf]  ;;  %v640_v17 = vor.u32 %v674_v13, %v637_v14  ;;  %v671_v18 = vld [vmem:[%s1008_s3 + $0xcc] sm:$0xf0]  ;;  %v669_v19 = vld [vmem:[%s1008_s3 + $0xc4] sm:$0xf] }
   0x6   :  { %313 = vmatpush.bf16.msra.mxu1 %v628_v7  ;;  %v613_v20 = vld [vmem:[%s1008_s3 + $0xd0] sm:$0xf0]  ;;  %71 = vmatpush.bf16.msra.mxu0 %v641_v1  ;;  %v612_v21 = vor.u32 %v671_v18, %v611_v15  ;;  %v619_v23 = vld [vmem:[%s1008_s3 + $0xc8] sm:$0xf]  ;;  %v672_v24 = vld [vmem:[%s1008_s3 + $0xd4] sm:$0xf0] }
   0x7   :  { %332 = vmatpush.bf16.msra.mxu2 %v632_v11  ;;  %v616_v22 = vor.u32 %v669_v19, %v613_v20  ;;  %v670_v25 = vld [vmem:[%s1008_s3 + $0xcc] sm:$0xf]  ;;  %351 = vmatpush.bf16.msra.mxu3 %v636_v12  ;;  %v620_v26 = vor.u32 %v672_v24, %v619_v23  ;;  %v621_v27 = vld [vmem:[%s1008_s3 + $0xd8] sm:$0xf0]  ;;  %v33_v29 = vld [vmem:[%s1007_s0 + $0x10] sm:$0xff] }
   0x8   :  { %v624_v28 = vor.u32 %v670_v25, %v621_v27  ;;  %v34_v30 = vld [vmem:[%s1007_s0 + $0x18] sm:$0xff]  ;;  %v595_v32 = vld [vmem:[%s1008_s3 + $0xa0] sm:$0xf]  ;;  %v667_v33 = vld [vmem:[%s1008_s3 + $0xac] sm:$0xf0] }
   0x9   :  { %503 = vmatmul.msk.bf16.vlgmr.msra.gmra.mxu0 %vm57_vm0, %v35_v16  ;;  %v36_v31 = vpack.c.bf16 %v34_v30, %v33_v29  ;;  %v665_v34 = vld [vmem:[%s1008_s3 + $0xa4] sm:$0xf]  ;;  %v596_v35 = vor.u32 %v667_v33, %v595_v32  ;;  %v597_v36 = vld [vmem:[%s1008_s3 + $0xb0] sm:$0xf0]  ;;  %v603_v37 = vld [vmem:[%s1008_s3 + $0xa8] sm:$0xf] }
   0xa   :  { %370 = vmatpush.bf16.msrb.mxu0 %v640_v17  ;;  %314 = vmatpush.bf16.msra.mxu1 %v612_v21  ;;  %v668_v38 = vld [vmem:[%s1008_s3 + $0xb4] sm:$0xf0]  ;;  %v600_v39 = vor.u32 %v665_v34, %v597_v36  ;;  %v666_v41 = vld [vmem:[%s1008_s3 + $0xac] sm:$0xf]  ;;  %v605_v42 = vld [vmem:[%s1008_s3 + $0xb8] sm:$0xf0] }
   0xb   :  { %333 = vmatpush.bf16.msra.mxu2 %v616_v22  ;;  %352 = vmatpush.bf16.msra.mxu3 %v620_v26  ;;  %v604_v40 = vor.u32 %v668_v38, %v603_v37  ;;  %v608_v43 = vor.u32 %v666_v41, %v605_v42  ;;  %v579_v44 = vld [vmem:[%s1008_s3 + $0x80] sm:$0xf]  ;;  %v663_v45 = vld [vmem:[%s1008_s3 + $0x8c] sm:$0xf0]  ;;  %v661_v46 = vld [vmem:[%s1008_s3 + $0x84] sm:$0xf] }
   0xc   :  { %v580_v47 = vor.u32 %v663_v45, %v579_v44  ;;  %v581_v48 = vld [vmem:[%s1008_s3 + $0x90] sm:$0xf0]  ;;  %v587_v49 = vld [vmem:[%s1008_s3 + $0x88] sm:$0xf]  ;;  %v664_v50 = vld [vmem:[%s1008_s3 + $0x94] sm:$0xf0] }
   0xd   :  { %v584_v51 = vor.u32 %v661_v46, %v581_v48  ;;  %v588_v52 = vor.u32 %v664_v50, %v587_v49  ;;  %v662_v53 = vld [vmem:[%s1008_s3 + $0x8c] sm:$0xf]  ;;  %v589_v54 = vld [vmem:[%s1008_s3 + $0x98] sm:$0xf0]  ;;  %v563_v56 = vld [vmem:[%s1008_s3 + $0x60] sm:$0xf] }
   0xe   :  { %371 = vmatpush.bf16.msrb.mxu0 %v624_v28  ;;  %315 = vmatpush.bf16.msra.mxu1 %v596_v35  ;;  %v592_v55 = vor.u32 %v662_v53, %v589_v54  ;;  %v659_v57 = vld [vmem:[%s1008_s3 + $0x6c] sm:$0xf0]  ;;  %v657_v58 = vld [vmem:[%s1008_s3 + $0x64] sm:$0xf]  ;;  %v565_v60 = vld [vmem:[%s1008_s3 + $0x70] sm:$0xf0] }
   0xf   :  { %334 = vmatpush.bf16.msra.mxu2 %v600_v39  ;;  %353 = vmatpush.bf16.msra.mxu3 %v604_v40  ;;  %v564_v59 = vor.u32 %v659_v57, %v563_v56  ;;  %v571_v61 = vld [vmem:[%s1008_s3 + $0x68] sm:$0xf]  ;;  %v660_v62 = vld [vmem:[%s1008_s3 + $0x74] sm:$0xf0]  ;;  %v568_v63 = vor.u32 %v657_v58, %v565_v60  ;;  %v658_v1 = vld [vmem:[%s1008_s3 + $0x6c] sm:$0xf] }
  0x10   :  { %v572_v0 = vor.u32 %v660_v62, %v571_v61  ;;  %v573_v2 = vld [vmem:[%s1008_s3 + $0x78] sm:$0xf0]  ;;  %v547_v4 = vld [vmem:[%s1008_s3 + $0x40] sm:$0xf]  ;;  %v655_v5 = vld [vmem:[%s1008_s3 + $0x4c] sm:$0xf0] }
  0x11   :  { %v576_v3 = vor.u32 %v658_v1, %v573_v2  ;;  %v653_v6 = vld [vmem:[%s1008_s3 + $0x44] sm:$0xf]  ;;  %v548_v7 = vor.u32 %v655_v5, %v547_v4  ;;  %v549_v8 = vld [vmem:[%s1008_s3 + $0x50] sm:$0xf0]  ;;  %v555_v9 = vld [vmem:[%s1008_s3 + $0x48] sm:$0xf] }
  0x12   :  { %372 = vmatpush.bf16.msrb.mxu0 %v608_v43  ;;  %316 = vmatpush.bf16.msra.mxu1 %v580_v47  ;;  %v656_v10 = vld [vmem:[%s1008_s3 + $0x54] sm:$0xf0]  ;;  %v552_v11 = vor.u32 %v653_v6, %v549_v8  ;;  %v654_v13 = vld [vmem:[%s1008_s3 + $0x4c] sm:$0xf]  ;;  %v557_v14 = vld [vmem:[%s1008_s3 + $0x58] sm:$0xf0] }
  0x13   :  { %335 = vmatpush.bf16.msra.mxu2 %v584_v51  ;;  %354 = vmatpush.bf16.msra.mxu3 %v588_v52  ;;  %v556_v12 = vor.u32 %v656_v10, %v555_v9  ;;  %v560_v15 = vor.u32 %v654_v13, %v557_v14  ;;  %v531_v16 = vld [vmem:[%s1008_s3 + $0x20] sm:$0xf]  ;;  %v651_v17 = vld [vmem:[%s1008_s3 + $0x2c] sm:$0xf0]  ;;  %v649_v18 = vld [vmem:[%s1008_s3 + $0x24] sm:$0xf] }
  0x14   :  { %v532_v19 = vor.u32 %v651_v17, %v531_v16  ;;  %v533_v20 = vld [vmem:[%s1008_s3 + $0x30] sm:$0xf0]  ;;  %v539_v21 = vld [vmem:[%s1008_s3 + $0x28] sm:$0xf]  ;;  %v652_v22 = vld [vmem:[%s1008_s3 + $0x34] sm:$0xf0] }
  0x15   :  { %v536_v23 = vor.u32 %v649_v18, %v533_v20  ;;  %v540_v24 = vor.u32 %v652_v22, %v539_v21  ;;  %v650_v25 = vld [vmem:[%s1008_s3 + $0x2c] sm:$0xf]  ;;  %v541_v26 = vld [vmem:[%s1008_s3 + $0x38] sm:$0xf0]  ;;  %v515_v28 = vld [vmem:[%s1008_s3] sm:$0xf] }
  0x16   :  { %373 = vmatpush.bf16.msrb.mxu0 %v592_v55  ;;  %317 = vmatpush.bf16.msra.mxu1 %v564_v59  ;;  %v544_v27 = vor.u32 %v650_v25, %v541_v26  ;;  %v647_v29 = vld [vmem:[%s1008_s3 + $0xc] sm:$0xf0]  ;;  %v645_v30 = vld [vmem:[%s1008_s3 + $0x4] sm:$0xf]  ;;  %v517_v32 = vld [vmem:[%s1008_s3 + $0x10] sm:$0xf0] }
  0x17   :  { %336 = vmatpush.bf16.msra.mxu2 %v568_v63  ;;  %355 = vmatpush.bf16.msra.mxu3 %v572_v0  ;;  %v523_v33 = vld [vmem:[%s1008_s3 + $0x8] sm:$0xf]  ;;  %v648_v34 = vld [vmem:[%s1008_s3 + $0x14] sm:$0xf0]  ;;  %v520_v35 = vor.u32 %v645_v30, %v517_v32  ;;  %v646_v37 = vld [vmem:[%s1008_s3 + $0xc] sm:$0xf] }
  0x18   :  { %v524_v36 = vor.u32 %v648_v34, %v523_v33  ;;  %v525_v38 = vld [vmem:[%s1008_s3 + $0x18] sm:$0xf0]  ;;  %v688_v41 = vld [vmem:[%s1009_s2] ss:$0 sm:$0xff] }
  0x19   :  { %504 = vmatmul.msk.bf16.gmra.mxu0 %vm57_vm0, %v36_v31  ;;  %v516_v31 = vor.u32 %v647_v29, %v515_v28  ;;  %v528_v39 = vor.u32 %v646_v37, %v525_v38  ;;  %v131_v57 = vld [vmem:[%s1010_s4] sm:$0xf] }
  0x1a   :  { %374 = vmatpush.bf16.msrb.mxu0 %v576_v3  ;;  %318 = vmatpush.bf16.msra.mxu1 %v548_v7  ;;  %v133_v58 = vperm.slane %v131_v57, 0  ;;  %v405_v59 = vld [vmem:[%s1011_s5] sm:$0xf]  ;;  %v951_v62 = vperm.slane %v131_v57, 3  ;;  %v134_v2 = vperm.slane %v131_v57, 1  ;;  %v135_v7 = vperm.slane %v131_v57, 2 }
  0x1b   :  { %337 = vmatpush.bf16.msra.mxu2 %v552_v11  ;;  %356 = vmatpush.bf16.msra.mxu3 %v556_v12  ;;  %v953_v63 = vperm.slane %v405_v59, 0  ;;  %v957_v9 = vperm.slane %v405_v59, 1  ;;  %v959_v13 = vperm.slane %v405_v59, 3  ;;  %v409_v22 = vperm.slane %v405_v59, 2 }
  0x1e   :  { %375 = vmatpush.bf16.msrb.mxu0 %v560_v15  ;;  %319 = vmatpush.bf16.msra.mxu1 %v532_v19 }
  0x1f   :  { %338 = vmatpush.bf16.msra.mxu2 %v536_v23  ;;  %357 = vmatpush.bf16.msra.mxu3 %v540_v24 }
  0x22   :  { %376 = vmatpush.bf16.msrb.mxu0 %v544_v27  ;;  %320 = vmatpush.bf16.msra.mxu1 %v516_v31 }
  0x23   :  { %339 = vmatpush.bf16.msra.mxu2 %v520_v35  ;;  %358 = vmatpush.bf16.msra.mxu3 %v524_v36 }
  0x26   :  { %377 = vmatpush.bf16.msrb.mxu0 %v528_v39 }
  0x86   :  { %v73_v40 = vpop.f32.mrf.mxu0 }
  0x87   :  { %v74_v42 = vadd.f32 %v688_v41, %v73_v40 }
  0x89   :  { %v83_v45 = vmax.f32 %v74_v42, 0.0 }
  0x8e   :  { %v75_v43 = vpop.f32.mrf.mxu0 }
  0x8f   :  { %v76_v44 = vadd.f32 %v688_v41, %v75_v43 }
  0x91   :  { %v84_v46 = vmax.f32 %v76_v44, 0.0 }
  0x93   :  { %v680_v47 = vpack.c.bf16 %v84_v46, %v83_v45 }
  0x95   :  { %681 = vst [vmem:[#allocation2] sm:$0xff] %v680_v47  }
  0x96   :  { %v78_v48 = vpop.f32.mrf.mxu0 }
  0x97   :  { %v79_v50 = vadd.f32 %v688_v41, %v78_v48 }
  0x99   :  { %v85_v53 = vmax.f32 %v79_v50, 0.0 }
  0x9c   :  { %v643_v49 = vld [vmem:[#allocation2] sm:$0xff] }
  0x9d   :  { %321 = vmatmul.bf16.vlgmr.msra.gmra.mxu1 %v643_v49  ;;  %340 = vmatmul.bf16.vlgmr.msra.gmra.mxu2 %v643_v49 }
  0x9e   :  { %v80_v51 = vpop.f32.mrf.mxu0  ;;  %359 = vmatmul.bf16.vlgmr.msra.gmra.mxu3 %v643_v49  ;;  %378 = vmatmul.bf16.vlgmr.msrb.gmra.mxu0 %v643_v49 }
  0x9f   :  { %v81_v52 = vadd.f32 %v688_v41, %v80_v51 }
  0xa1   :  { %v86_v54 = vmax.f32 %v81_v52, 0.0 }
  0xa3   :  { %v685_v55 = vpack.c.bf16 %v86_v54, %v85_v53 }
  0xa5   :  { %687 = vst [vmem:[#allocation2 + $0x8] sm:$0xff] %v685_v55  }
  0xac   :  { %v644_v56 = vld [vmem:[#allocation2 + $0x8] sm:$0xff] }
  0xad   :  { %326 = vmatmul.bf16.gmra.mxu1 %v644_v56  ;;  %345 = vmatmul.bf16.gmra.mxu2 %v644_v56 }
  0xae   :  { %364 = vmatmul.bf16.gmra.mxu3 %v644_v56  ;;  %383 = vmatmul.bf16.gmra.mxu0 %v644_v56 }
 0x11a   :  { %v322_v60 = vpop.f32.mrf.mxu1 }
 0x11b   :  { %v323_v61 = vadd.f32 %v322_v60, %v133_v58  ;;  %v379_v0 = vpop.f32.mrf.mxu0 }
 0x11c   :  { %v380_v3 = vadd.f32 %v379_v0, %v951_v62 }
 0x11d   :  { %v389_v1 = vmax.f32 %v323_v61, 0.0 }
 0x11e   :  { %v392_v11 = vmax.f32 %v380_v3, 0.0 }
 0x11f   :  { %v415_v4 = vmul.f32 %v953_v63, %v389_v1 }
 0x120   :  { %v341_v5 = vpop.f32.mrf.mxu2  ;;  %v418_v17 = vmul.f32 %v959_v13, %v392_v11 }
 0x121   :  { %v342_v6 = vadd.f32 %v341_v5, %v134_v2  ;;  %v360_v8 = vpop.f32.mrf.mxu3  ;;  %431 = vadd.xlane.f32.xlu0 %v415_v4 }
 0x122   :  { %v324_v10 = vpop.f32.mrf.mxu1  ;;  %v361_v14 = vadd.f32 %v360_v8, %v135_v7 }
 0x123   :  { %v390_v12 = vmax.f32 %v342_v6, 0.0  ;;  %v325_v16 = vadd.f32 %v324_v10, %v133_v58  ;;  %v381_v18 = vpop.f32.mrf.mxu0 }
 0x124   :  { %v391_v20 = vmax.f32 %v361_v14, 0.0  ;;  %v382_v0 = vadd.f32 %v381_v18, %v951_v62 }
 0x125   :  { %v416_v15 = vmul.f32 %v957_v9, %v390_v12  ;;  %v393_v24 = vmax.f32 %v325_v16, 0.0 }
 0x126   :  { %v417_v28 = vmul.f32 %v409_v22, %v391_v20 }
 0x127   :  { %439 = vadd.xlane.f32.xlu2 %v416_v15  ;;  %v419_v31 = vmul.f32 %v953_v63, %v393_v24 }
 0x128   :  { %v343_v19 = vpop.f32.mrf.mxu2 }
 0x129   :  { %v362_v21 = vpop.f32.mrf.mxu3  ;;  %455 = vadd.xlane.f32.xlu0 %v418_v17  ;;  %v344_v26 = vadd.f32 %v343_v19, %v134_v2 }
 0x12a   :  { %v327_v23 = vpop.f32.mrf.mxu1  ;;  %v363_v29 = vadd.f32 %v362_v21, %v135_v7 }
 0x12b   :  { %v328_v25 = vadd.f32 %v327_v23, %v133_v58  ;;  %v394_v32 = vmax.f32 %v344_v26, 0.0  ;;  %v384_v34 = vpop.f32.mrf.mxu0 }
 0x12c   :  { %v395_v37 = vmax.f32 %v363_v29, 0.0  ;;  %v385_v52 = vadd.f32 %v384_v34, %v951_v62 }
 0x12d   :  { %v397_v27 = vmax.f32 %v328_v25, 0.0  ;;  %v420_v40 = vmul.f32 %v957_v9, %v394_v32 }
 0x12e   :  { %v421_v44 = vmul.f32 %v409_v22, %v395_v37 }
 0x12f   :  { %447 = vadd.xlane.f32.xlu2 %v417_v28  ;;  %v423_v30 = vmul.f32 %v953_v63, %v397_v27 }
 0x130   :  { %v346_v35 = vpop.f32.mrf.mxu2 }
 0x131   :  { %v365_v33 = vpop.f32.mrf.mxu3  ;;  %435 = vadd.xlane.f32.xlu1 %v423_v30  ;;  %433 = vadd.xlane.f32.xlu0 %v419_v31  ;;  %v347_v41 = vadd.f32 %v346_v35, %v134_v2 }
 0x132   :  { %v366_v36 = vadd.f32 %v365_v33, %v135_v7  ;;  %v329_v39 = vpop.f32.mrf.mxu1 }
 0x133   :  { %v330_v42 = vadd.f32 %v329_v39, %v133_v58  ;;  %v398_v47 = vmax.f32 %v347_v41, 0.0  ;;  %v386_v49 = vpop.f32.mrf.mxu0  ;;  %v400_v58 = vmax.f32 %v385_v52, 0.0 }
 0x134   :  { %v399_v38 = vmax.f32 %v366_v36, 0.0  ;;  %v387_v54 = vadd.f32 %v386_v49, %v951_v62  ;;  %v689_v62 = vld [vmem:[%s1012_s6] ss:$0 sm:$0xff] }
 0x135   :  { %v401_v48 = vmax.f32 %v330_v42, 0.0  ;;  %v424_v57 = vmul.f32 %v957_v9, %v398_v47  ;;  %v426_v61 = vmul.f32 %v959_v13, %v400_v58 }
 0x136   :  { %v425_v43 = vmul.f32 %v409_v22, %v399_v38  ;;  %v404_v59 = vmax.f32 %v387_v54, 0.0 }
 0x137   :  { %441 = vadd.xlane.f32.xlu2 %v420_v40  ;;  %v427_v56 = vmul.f32 %v953_v63, %v401_v48  ;;  %v396_v63 = vmax.f32 %v382_v0, 0.0 }
 0x138   :  { %v348_v50 = vpop.f32.mrf.mxu2  ;;  %v430_v3 = vmul.f32 %v959_v13, %v404_v59 }
 0x139   :  { %v367_v45 = vpop.f32.mrf.mxu3  ;;  %451 = vadd.xlane.f32.xlu1 %v425_v43  ;;  %449 = vadd.xlane.f32.xlu0 %v421_v44  ;;  %v349_v55 = vadd.f32 %v348_v50, %v134_v2  ;;  %v422_v2 = vmul.f32 %v959_v13, %v396_v63 }
 0x13a   :  { %v368_v46 = vadd.f32 %v367_v45, %v135_v7 }
 0x13b   :  { %v402_v60 = vmax.f32 %v349_v55, 0.0 }
 0x13c   :  { %v403_v51 = vmax.f32 %v368_v46, 0.0 }
 0x13d   :  { %v428_v1 = vmul.f32 %v957_v9, %v402_v60 }
 0x13e   :  { %v429_v53 = vmul.f32 %v409_v22, %v403_v51 }
 0x140   :  { %453 = vadd.xlane.f32.xlu2 %v429_v53 }
 0x141   :  { %437 = vadd.xlane.f32.xlu1 %v427_v56  ;;  %443 = vadd.xlane.f32.xlu0 %v424_v57 }
 0x148   :  { %459 = vadd.xlane.f32.xlu2 %v426_v61 }
 0x149   :  { %445 = vadd.xlane.f32.xlu1 %v428_v1  ;;  %461 = vadd.xlane.f32.xlu0 %v430_v3 }
 0x151   :  { %457 = vadd.xlane.f32.xlu1 %v422_v2 }
 0x194   :  { %v432_v4 = vpop.xlane.xlu0 %431 }
 0x19a   :  { %v440_v5 = vpop.xlane.xlu2 %439 }
 0x19b   :  { %v464_v7 = vsel %vm463_vm1, %v432_v4, %v440_v5 }
 0x19c   :  { %v456_v6 = vpop.xlane.xlu0 %455 }
 0x1a2   :  { %v448_v8 = vpop.xlane.xlu2 %447 }
 0x1a3   :  { %v469_v9 = vsel %vm468_vm2, %v464_v7, %v448_v8 }
 0x1a4   :  { %v474_v10 = vsel %vm473_vm3, %v469_v9, %v456_v6  ;;  %v436_v11 = vpop.xlane.xlu1 %435  ;;  %v434_v12 = vpop.xlane.xlu0 %433 }
 0x1a5   :  { %v482_v13 = vadd.f32 %v689_v62, %v474_v10 }
 0x1a7   :  { %487 = vst.msk [vmem:[%s1013_s7] sm:$0xff] %vm486_vm4, %v482_v13 }
 0x1aa   :  { %v442_v14 = vpop.xlane.xlu2 %441 }
 0x1ab   :  { %v465_v31 = vsel %vm463_vm1, %v434_v12, %v442_v14 }
 0x1ac   :  { %v452_v15 = vpop.xlane.xlu1 %451  ;;  %v450_v16 = vpop.xlane.xlu0 %449 }
 0x1ad   :  { %v470_v32 = vsel %vm468_vm2, %v465_v31, %v450_v16 }
 0x1b3   :  { %v454_v17 = vpop.xlane.xlu2 %453 }
 0x1b4   :  { %v438_v18 = vpop.xlane.xlu1 %437  ;;  %v444_v19 = vpop.xlane.xlu0 %443 }
 0x1b5   :  { %v466_v20 = vsel %vm463_vm1, %v436_v11, %v444_v19 }
 0x1b6   :  { %v471_v22 = vsel %vm468_vm2, %v466_v20, %v452_v15 }
 0x1bb   :  { %v460_v21 = vpop.xlane.xlu2 %459 }
 0x1bc   :  { %v476_v23 = vsel %vm473_vm3, %v471_v22, %v460_v21  ;;  %v446_v24 = vpop.xlane.xlu1 %445  ;;  %v462_v28 = vpop.xlane.xlu0 %461 }
 0x1bd   :  { %v484_v25 = vadd.f32 %v689_v62, %v476_v23  ;;  %v467_v26 = vsel %vm463_vm1, %v438_v18, %v446_v24 }
 0x1be   :  { %v472_v27 = vsel %vm468_vm2, %v467_v26, %v454_v17 }
 0x1bf   :  { %489 = vst.msk [vmem:[%s1013_s7 + $0x10] sm:$0xff] %vm486_vm4, %v484_v25  ;;  %v477_v29 = vsel %vm473_vm3, %v472_v27, %v462_v28 }
 0x1c0   :  { %v485_v30 = vadd.f32 %v689_v62, %v477_v29 }
 0x1c2   :  { %490 = vst.msk [vmem:[%s1013_s7 + $0x18] sm:$0xff] %vm486_vm4, %v485_v30 }
 0x1c4   :  { %v458_v33 = vpop.xlane.xlu1 %457 }
 0x1c5   :  { %v475_v34 = vsel %vm473_vm3, %v470_v32, %v458_v33 }
 0x1c6   :  { %v483_v35 = vadd.f32 %v689_v62, %v475_v34 }
 0x1c8   :  { %488 = vst.msk [vmem:[%s1013_s7 + $0x8] sm:$0xff] %vm486_vm4, %v483_v35 }

</bundles_post_ra>
